<compile_context>
chip_gen: v6e
topology: v6e:2x2x1
jax: 0.10.0
libtpu: 0.0.40
codegen_flags: <defaults>
</compile_context>

<pallas_src>
import functools

import jax
import jax.numpy as jnp
from jax.experimental import pallas as pl
from jax.experimental.pallas import tpu as pltpu


def _round_up(x, m):
    return ((x + m - 1) // m) * m


def _conv1d_kernel(x_ref, w_ref, b_ref, o_ref, *, k, c_in_pad, tile_l,
                   tap_phase, tap_off):
    """One (batch, L-tile) grid step of Conv1d.

    x_ref: (1, 1, n_phase*C_in_pad, tile_in)  framed, phase-split input window
    w_ref: (C_out_pad, K*C_in_pad)            tap-major packed weight
    b_ref: (C_out_pad, 1)                     f32 bias
    o_ref: (1, C_out_pad, tile_l)             lane-dense output tile
    """
    xw = x_ref[0, 0]                              # (n_phase*C_in_pad, tile_in)
    taps = []
    for t in range(k):                            # static unroll over taps
        r0 = tap_phase[t] * c_in_pad              # sublane-aligned row offset
        off = tap_off[t]                          # contiguous lane offset
        taps.append(xw[r0:r0 + c_in_pad, off:off + tile_l])
    xcol = taps[0] if k == 1 else jnp.concatenate(taps, axis=0)
    acc = jnp.dot(w_ref[...], xcol, preferred_element_type=jnp.float32)
    o_ref[0] = (acc + b_ref[...]).astype(o_ref.dtype)


def _const_block_spec(shape):
    """Constant-index BlockSpec, single-buffered when the jax version allows."""
    index_map = lambda i, j: (0,) * len(shape)
    try:
        return pl.BlockSpec(shape, index_map, pipeline_mode=pl.Buffered(1))
    except TypeError:  # older jax without BlockSpec.pipeline_mode
        return pl.BlockSpec(shape, index_map)


def conv_norm_forward(x, weight, bias=None, *, stride=1, padding=None,
                      dilation=1, tile_l=None, compute_dtype=None):
    """Conv1d matching torch.nn.Conv1d(in, out, k, stride, padding, dilation).

    x: (B, C_in, L), weight: (C_out, C_in, K), bias: (C_out,) or None.
    compute_dtype: optional cast for x/weight (e.g. jnp.bfloat16); accumulation
    stays f32 and the output keeps x's original dtype.
    """
    b, c_in, l = x.shape
    c_out, c_in_w, k = weight.shape
    assert c_in == c_in_w

    if padding is None:
        assert k % 2 == 1, "auto 'same' padding requires odd kernel_size"
        padding = int(dilation * (k - 1) / 2)

    out_dtype = x.dtype
    if compute_dtype is not None:
        x = x.astype(compute_dtype)
        weight = weight.astype(compute_dtype)
    cdt = x.dtype
    itemsize = jnp.dtype(cdt).itemsize
    out_itemsize = jnp.dtype(out_dtype).itemsize

    # Sublane packs: 8 rows/vreg for 4-byte dtypes, 16 for 2-byte dtypes.
    sub = 8 if itemsize >= 4 else 16
    c_in_pad = _round_up(c_in, sub)
    c_out_pad = _round_up(c_out, 8)

    l_out = (l + 2 * padding - dilation * (k - 1) - 1) // stride + 1
    assert l_out > 0, "convolution output is empty"

    # Tap decomposition: input index for output position q is
    #   q*stride + t*dilation = (q + tap_off[t])*stride + phase[t]
    # so tap t reads a CONTIGUOUS window of one phase plane.
    tap_off = tuple((t * dilation) // stride for t in range(k))
    raw_phase = tuple((t * dilation) % stride for t in range(k))
    used_phases = sorted(set(raw_phase))
    tap_phase = tuple(used_phases.index(r) for r in raw_phase)
    n_phase = len(used_phases)
    halo = max(tap_off)

    # Lane-dense output tiling: tile_l multiple of 128, default up to 1024.
    if tile_l is None:
        tile_l = min(1024, _round_up(l_out, 128))
    assert tile_l % 128 == 0 and tile_l > 0

    # Generation-aware VMEM budget (64 MiB on v7x, 128 MiB on v5e/v6e).
    try:
        vmem_cap = int(pltpu.get_tpu_info().vmem_capacity_bytes)
    except Exception:
        vmem_cap = 64 * 1024 * 1024  # conservative fallback (v7x size)

    def vmem_needed(tl):
        tin = _round_up(tl + halo, 128)
        return (2 * n_phase * c_in_pad * tin * itemsize   # input frames (2 bufs)
                + c_out_pad * k * c_in_pad * itemsize     # weight (1 buf)
                + 8 * 128 * 4                             # bias tile
                + 2 * c_out_pad * tl * out_itemsize       # output (2 bufs)
                + 2 * k * c_in_pad * tl * itemsize)       # xcol value / spill headroom

    while tile_l > 128 and vmem_needed(tile_l) > int(0.6 * vmem_cap):
        tile_l -= 128

    n_tiles = pl.cdiv(l_out, tile_l)
    l_out_pad = n_tiles * tile_l
    tile_in = _round_up(tile_l + halo, 128)

    # One fused pad: "same" left pad + right pad so every phase-plane tile
    # window stays in bounds; total padded length is a multiple of `stride`.
    m_total = (n_tiles - 1) * tile_l + tile_in
    total_len = _round_up(max(m_total * stride, l + padding), stride)
    m_total = total_len // stride
    x_p = jnp.pad(x, ((0, 0), (0, c_in_pad - c_in),
                      (padding, total_len - l - padding)))

    # Phase-plane de-interleave + halo framing (pure XLA layout plumbing;
    # only the per-tile halo is duplicated, not the whole sequence).
    x_ph = x_p.reshape(b, c_in_pad, m_total, stride).transpose(0, 3, 1, 2)
    x_ph = x_ph[:, jnp.asarray(used_phases)]            # (B, n_phase, C_in_pad, M)
    starts = jnp.arange(n_tiles) * tile_l
    idx = starts[:, None] + jnp.arange(tile_in)[None, :]  # (n_tiles, tile_in)
    x_frames = x_ph[:, :, :, idx]                       # (B, n_phase, C_in_pad, n_tiles, tile_in)
    x_frames = x_frames.transpose(0, 3, 1, 2, 4).reshape(
        b, n_tiles, n_phase * c_in_pad, tile_in)

    # Tap-major packed weight (column block t holds weight[:, :, t]); padded
    # rows/columns are zero and numerically inert.
    w_p = jnp.pad(weight, ((0, c_out_pad - c_out), (0, c_in_pad - c_in), (0, 0)))
    w_packed = jnp.transpose(w_p, (0, 2, 1)).reshape(c_out_pad, k * c_in_pad)

    if bias is None:
        bias = jnp.zeros((c_out,), jnp.float32)
    bias2d = jnp.pad(bias.astype(jnp.float32),
                     (0, c_out_pad - c_out)).reshape(c_out_pad, 1)

    kernel = functools.partial(_conv1d_kernel, k=k, c_in_pad=c_in_pad,
                               tile_l=tile_l, tap_phase=tap_phase,
                               tap_off=tap_off)

    need = vmem_needed(tile_l)
    vmem_limit = min(int(0.75 * vmem_cap), max(2 * need, 16 * 1024 * 1024))
    vmem_limit = int(max(vmem_limit, need + 2 * 1024 * 1024))

    cost = pl.CostEstimate(
        flops=2 * b * c_out_pad * k * c_in_pad * l_out_pad,
        transcendentals=0,
        bytes_accessed=int(x_frames.size * itemsize + w_packed.size * itemsize
                           + b * c_out_pad * l_out_pad * out_itemsize),
    )

    out = pl.pallas_call(
        kernel,
        out_shape=jax.ShapeDtypeStruct((b, c_out_pad, l_out_pad), out_dtype),
        grid_spec=pltpu.PrefetchScalarGridSpec(
            num_scalar_prefetch=0,
            grid=(b, n_tiles),
            in_specs=[
                # Per-(batch, tile) framed window: VMEM stays O(tile) and each
                # TensorCore only fetches its own tiles.
                pl.BlockSpec((1, 1, n_phase * c_in_pad, tile_in),
                             lambda i, j: (i, j, 0, 0)),
                _const_block_spec((c_out_pad, k * c_in_pad)),
                _const_block_spec((c_out_pad, 1)),
            ],
            out_specs=pl.BlockSpec((1, c_out_pad, tile_l),
                                   lambda i, j: (i, 0, j)),
        ),
        compiler_params=pltpu.CompilerParams(
            dimension_semantics=("parallel", "parallel"),
            vmem_limit_bytes=vmem_limit),
        cost_estimate=cost,
    )(x_frames, w_packed, bias2d)

    return out[:, :c_out, :l_out]


if __name__ == "__main__":
    # ConvNorm(in_channels=4, out_channels=6, kernel_size=3) -> "same" padding.
    B, C_IN, C_OUT, L, K = 2, 4, 6, 16, 3

    key = jax.random.PRNGKey(0)
    kx, kw, kb = jax.random.split(key, 3)

    x = jax.random.normal(kx, (B, C_IN, L), dtype=jnp.float32)
    bound = 1.0 / (C_IN * K) ** 0.5
    weight = jax.random.uniform(kw, (C_OUT, C_IN, K), jnp.float32, -bound, bound)
    bias = jax.random.uniform(kb, (C_OUT,), jnp.float32, -bound, bound)

    def conv_ref(xr, wr, br, *, stride=1, padding=1, dilation=1):
        out = jax.lax.conv_general_dilated(
            xr, wr, window_strides=(stride,), padding=[(padding, padding)],
            rhs_dilation=(dilation,), dimension_numbers=("NCH", "OIH", "NCH"),
            precision=jax.lax.Precision.HIGHEST)
        return out + br.reshape(1, -1, 1)

    # f32 checks use a tolerance loose enough to absorb MXU precision for f32
    # operands on any TPU generation, but tight enough to catch any
    # indexing/padding/phase error (which produce O(0.1) discrepancies).
    F32_TOL = dict(atol=2e-2, rtol=2e-2)

    # 1) Default ConvNorm: stride 1, auto "same" padding = 1.
    out = jax.block_until_ready(conv_norm_forward(x, weight, bias))
    ref = conv_ref(x, weight, bias, padding=1)
    assert out.shape == (B, C_OUT, L)
    assert jnp.allclose(out, ref, **F32_TOL)

    # 2) bf16 compute path (MXU-native dtype, f32 accumulation); reference uses
    # the same bf16-rounded inputs so only accumulation-order error remains.
    out_bf = jax.block_until_ready(
        conv_norm_forward(x, weight, bias, compute_dtype=jnp.bfloat16))
    ref_bf = conv_ref(x.astype(jnp.bfloat16).astype(jnp.float32),
                      weight.astype(jnp.bfloat16).astype(jnp.float32),
                      bias, padding=1)
    assert out_bf.shape == (B, C_OUT, L)
    assert jnp.allclose(out_bf, ref_bf, atol=1e-3, rtol=1e-3)

    # 3) stride=2 exercises the phase-plane path (no strided lane loads).
    out_s2 = jax.block_until_ready(conv_norm_forward(x, weight, bias, stride=2))
    ref_s2 = conv_ref(x, weight, bias, stride=2, padding=1)
    assert out_s2.shape == ref_s2.shape == (B, C_OUT, 8)
    assert jnp.allclose(out_s2, ref_s2, **F32_TOL)

    # 4) dilation=2 (auto "same" padding = 2).
    out_d2 = jax.block_until_ready(conv_norm_forward(x, weight, bias, dilation=2))
    ref_d2 = conv_ref(x, weight, bias, padding=2, dilation=2)
    assert out_d2.shape == (B, C_OUT, L)
    assert jnp.allclose(out_d2, ref_d2, **F32_TOL)

    print("KERNEL_OK")
</pallas_src>

<mosaic_0001>
module attributes {stable_mosaic.version = 11 : i64} {
  func.func @_conv1d_kernel(%arg0: i32, %arg1: i32, %arg2: memref<1x1x8x256xf32, #tpu.memory_space<vmem>>, %arg3: memref<8x24xf32, #tpu.memory_space<vmem>>, %arg4: memref<8x1xf32, #tpu.memory_space<vmem>>, %arg5: memref<1x8x128xf32, #tpu.memory_space<vmem>>) attributes {dimension_semantics = [#tpu.dimension_semantics<parallel>, #tpu.dimension_semantics<parallel>], iteration_bounds = array<i64: 2, 1>, scalar_prefetch = 0 : i64, scratch_operands = 0 : i64, tpu.core_type = #tpu.core_type<tc>, window_params = [{transform_indices = @transform_0, window_bounds = array<i64: 1, 1, 8, 256>}, {pipeline_mode = #tpu.pipeline_mode<synchronous>, transform_indices = @transform_1, window_bounds = array<i64: 8, 24>}, {pipeline_mode = #tpu.pipeline_mode<synchronous>, transform_indices = @transform_2, window_bounds = array<i64: 8, 1>}, {transform_indices = @transform_3, window_bounds = array<i64: 1, 8, 128>}]} {
    %c0 = arith.constant 0 : index
    %c0_0 = arith.constant 0 : index
    %c0_1 = arith.constant 0 : index
    %c0_2 = arith.constant 0 : index
    %0 = vector.load %arg2[%c0, %c0_0, %c0_1, %c0_2] : memref<1x1x8x256xf32, #tpu.memory_space<vmem>>, vector<1x1x8x256xf32>
    %1 = vector.shape_cast %0 : vector<1x1x8x256xf32> to vector<8x256xf32>
    %2 = vector.extract_strided_slice %1 {offsets = [0, 0], sizes = [8, 128], strides = [1, 1]} : vector<8x256xf32> to vector<8x128xf32>
    %3 = vector.extract_strided_slice %1 {offsets = [0, 1], sizes = [8, 128], strides = [1, 1]} : vector<8x256xf32> to vector<8x128xf32>
    %4 = vector.extract_strided_slice %1 {offsets = [0, 2], sizes = [8, 128], strides = [1, 1]} : vector<8x256xf32> to vector<8x128xf32>
    %5 = tpu.concatenate %2, %3, %4 in 0 : vector<8x128xf32>, vector<8x128xf32>, vector<8x128xf32> -> vector<24x128xf32>
    %c0_3 = arith.constant 0 : index
    %c0_4 = arith.constant 0 : index
    %6 = vector.load %arg3[%c0_3, %c0_4] : memref<8x24xf32, #tpu.memory_space<vmem>>, vector<8x24xf32>
    %cst = arith.constant dense<0.000000e+00> : vector<8x128xf32>
    %7 = tpu.matmul %6, %5, %cst {dimension_numbers = #tpu.dot_dimension_numbers<[1], [0], [0], [1], [0, 0, 1, 1], [], []>} : vector<8x24xf32>, vector<24x128xf32>, vector<8x128xf32> -> vector<8x128xf32>
    %c0_5 = arith.constant 0 : index
    %c0_6 = arith.constant 0 : index
    %8 = vector.load %arg4[%c0_5, %c0_6] : memref<8x1xf32, #tpu.memory_space<vmem>>, vector<8x1xf32>
    %9 = vector.broadcast %8 : vector<8x1xf32> to vector<8x128xf32>
    %10 = arith.addf %7, %9 : vector<8x128xf32>
    %c0_7 = arith.constant 0 : index
    %c0_8 = arith.constant 0 : index
    %c0_9 = arith.constant 0 : index
    %11 = vector.load %arg5[%c0_7, %c0_8, %c0_9] : memref<1x8x128xf32, #tpu.memory_space<vmem>>, vector<1x8x128xf32>
    %12 = vector.shape_cast %11 : vector<1x8x128xf32> to vector<8x128xf32>
    %13 = vector.shape_cast %10 : vector<8x128xf32> to vector<1x8x128xf32>
    tpu.vector_store %arg5[%c0_7, %c0_8, %c0_9], %13 {strides = array<i32>} : memref<1x8x128xf32, #tpu.memory_space<vmem>>, vector<1x8x128xf32>,
    return
  }
  func.func @transform_0(%arg0: i32, %arg1: i32) -> (i32, i32, i32, i32) {
    %c0_i32 = arith.constant 0 : i32
    %c0_i32_0 = arith.constant 0 : i32
    %c0_i32_1 = arith.constant 0 : i32
    return %arg0, %arg1, %c0_i32, %c0_i32_0 : i32, i32, i32, i32
  }
  func.func @transform_1(%arg0: i32, %arg1: i32) -> (i32, i32) {
    %c0_i32 = arith.constant 0 : i32
    %c0_i32_0 = arith.constant 0 : i32
    %c0_i32_1 = arith.constant 0 : i32
    return %c0_i32, %c0_i32_0 : i32, i32
  }
  func.func @transform_2(%arg0: i32, %arg1: i32) -> (i32, i32) {
    %c0_i32 = arith.constant 0 : i32
    %c0_i32_0 = arith.constant 0 : i32
    %c0_i32_1 = arith.constant 0 : i32
    return %c0_i32, %c0_i32_0 : i32, i32
  }
  func.func @transform_3(%arg0: i32, %arg1: i32) -> (i32, i32, i32) {
    %c0_i32 = arith.constant 0 : i32
    %c0_i32_0 = arith.constant 0 : i32
    return %arg0, %c0_i32, %arg1 : i32, i32, i32
  }
}

</mosaic_0001>

<bundles_post_ra>
// kernel: tpu_custom_call.1
= control target key start
LH: loop header
LB: loop body
LE: loop exit
PB: predicated region body
PF: predicated region fallthrough
CT: control target
= control target key end

     0   :  { %8 = vsyncpa [#allocation3], 0  ;;  %s783_s0 = inlined_call_operand.hbm [shape: f32[2,1,8,256], index: 0, kind: input, shape index: {}]   ;;  %s784_s1 = inlined_call_operand.vmem [shape: f32[8,24], index: 1, kind: input, shape index: {}]   ;;  %s785_s2 = inlined_call_operand.vmem [shape: f32[8,1], index: 2, kind: input, shape index: {}]   ;;  %s786_s3 = inlined_call_operand.hbm [shape: f32[2,8,128], index: 3, kind: output, shape index: {}]  }
   0x1   :  { %10 = vsyncpa [#allocation3 + $0x1], 0 }
   0x2   :  { %11 = vsyncpa [#allocation4], 0 }
   0x3   :  { %13 = vsyncpa [#allocation4 + $0x1], 0  ;;  %s636_s12 = smov 0   ;;  %s638_s13 = smov 0  }
   0x4   :  { %s640_s14 = smov 0   ;;  %s642_s15 = smov 0  }
   0x5   :  { %s644_s16 = smov 0   ;;  %s646_s17 = smov 0  }
   0x6 LB: > { %s402_s18 = sadd.s32 4294967295, %s607_s17   ;;  %s403_s19 = sadd.s32 4294967294, %s607_s17   ;;  %s607_s17 = sphi %s646_s17, %s19_s17   ;;  %s603_s16 = sphi %s644_s16, %s798_s16   ;;  %s599_s15 = sphi %s642_s15, %s797_s15   ;;  %s595_s14 = sphi %s640_s14, %s796_s14   ;;  %s591_s13 = sphi %s638_s13, %s795_s13   ;;  %s587_s12 = sphi %s636_s12, %s794_s12  }
   0x7   : > { %s31_s20 = sadd.s32 1, %s603_s16  ;;  %s40_s21 = sadd.s32 1, %s595_s14 }
   0x8   : > { %p33_p0 = scmp.ge.s32.totalorder %s31_s20, 2  ;;  %p47_p1 = scmp.ne.s32.totalorder %s595_s14, %s591_s13 }
   0x9   : > { %p48_p2 = scmp.eq.s32.totalorder %s607_s17, 0  ;;  %p53_p3 = scmp.ne.s32.totalorder %s591_s13, %s587_s12 }
   0xa   : > { %s800_s20 = smov (%p33_p0, %s31_s20), 0  ;;  %p54_p5 = scmp.eq.s32.totalorder %s402_s18, 0 }
   0xb   : > { %p677_p4 = por %p48_p2, %p47_p1  ;;  %s35_s23 = ssub.s32 %s603_s16, %s800_s20 }
   0xc   : > { %p121_p6 = scmp.eq.s32.totalorder %s402_s18, 1  ;;  %p38_p7 = scmp.eq.s32.totalorder %s35_s23, 0 }
   0xd   : > { %p683_p8 = por %p54_p5, %p53_p3  ;;  %p127_p10 = scmp.eq.s32.totalorder %s403_s19, 1 }
   0xe   : > { %p687_p9 = por %p121_p6, %p47_p1  ;;  %p443_p13 = scmp.lt.s32.totalorder %s607_s17, 2 }
   0xf   : > { %s692_s26 = scalar_select %p38_p7, %s595_s14, %s40_s21  }
  0x10   : > { %p694_p11 = por %p127_p10, %p53_p3  ;;  %s153_s28 = sand.u32 1, %s595_s14  }
  0x11   : > { %s406_s29 = sshll.u32 %s153_s28, 4  ;;  %s417_s30 = sshll.u32 %s603_s16, 8 }
  0x12   : > { %s790_s27 = scalar_select %p694_p11, 1, 0 }
  0x13   : > { %s165_s6 = scalar_lea.hbm %s783_s0, %s417_s30  ;;  %s157_s7 = scalar_lea.vmem [#allocation2], %s406_s29 }
  0x14   : > { %s167_s8 = sshll.u32 %s157_s7, 4  ;;  %p707_p0 = pnand %p443_p13, %p677_p4  ;;  %s168_s8 = int_to_ptr.vmem [resolvable:$true] %s167_s8 }
  0x15   : > { %p409_p1 = scmp.ge.s32.totalorder %s607_s17, 1  ;;  %p172_p2 = scmp.lt.s32.totalorder %s607_s17, 3 }
  0x16   : > { %s154_s10 = scalar_lea.sflag [#allocation3], %s153_s28  ;;  %p501_p3 = pneg %p707_p0 }
  0x17   : > { %s512_s11 = scalar_lea.vmem %s168_s8, 256  ;;  %s609_s18 = smov [#allocation2]  }
  0x18   : > { %p513_p5 = scmp.ne.s32.totalorder %s168_s8, %s512_s11  ;;  %s517_s19 = sshll.u32 %s609_s18, 4  ;;  %s518_s19 = int_to_ptr.vmem [resolvable:$false] %s517_s19 }
  0x19   : > { %s519_s21 = scalar_lea.vmem %s518_s19, 512  ;;  %p520_p10 = scmp.lt.s32.totalorder %s168_s8, %s518_s19 }
  0x1a   : > { %p515_p6 = pnand %p513_p5, %p501_p3  ;;  %p521_p12 = scmp.lt.s32.totalorder %s519_s21, %s512_s11 }
  0x1c   : > { %p516_p7 = pneg %p515_p6  ;;  %p522_p4 = por %p521_p12, %p520_p10 }
  0x1e   : > { %p523_p13 = pnand %p522_p4, %p516_p7 }
  0x20   : > { %526 = shalt.err (!%p523_p13)
}
  0x21   : > { %438 = dma.hbm_to_vmem [thread:$0]  (!%p707_p0), %s165_s6, 256, %s168_s8, %s154_s10  }
  0x22   : > { %p173_p11 = pnand %p409_p1, %p172_p2 }
  0x23   : > { %s722_s22 = sand.u32 (!%p173_p11), 1, %s591_s13  }
  0x24   : > { %176 = sbr.rel (%p173_p11) target bundleno = 378 (0x17a), region = 32  ;;  %s410_s23 = sshll.u32 (!%p173_p11), %s722_s22, 4 }
  0x25   : > { %s179_s28 = scalar_lea.sflag (!%p173_p11), [#allocation3], %s722_s22  ;;  %s182_s29 = scalar_lea.vmem (!%p173_p11), [#allocation2], %s410_s23 }
  0x29   : > { %578 = dma.done.wait (%p683_p8), %s179_s28, 256  }
  0x2a   : > { %580 = vsyncadd (%p683_p8), %s179_s28, 4294967040  ;;  %v610_v0 = vmov 0.0   ;;  %vm611_vm0 = vmmov 0   ;;  %v612_v1 = vmov 0   ;;  %v205_v2 = vld [vmem:[%s182_s29] sm:$0xff]  ;;  %s613_s30 = smov 127  }
  0x2b   : > { %422 = vmatprep.subr.mxu0 %v610_v0  ;;  %428 = vmatprep.mubr.msk.f32.mxu0 %vm611_vm0, %v610_v0  ;;  %s614_s4 = smov 126   ;;  %v206_v3 = vld [vmem:[%s182_s29 + $0x8] sm:$0xff]  ;;  %v224_v4 = vld [vmem:[%s785_s2] sm:$0xff]  ;;  %vm220_vm1 = vcmask 1031168   ;;  %vm213_vm2 = vcmask 1039360   ;;  %vm230_vm3 = vcmask 195584  }
  0x2c   : > { %498 = vset.pattern.permute.xlu0 %v612_v1  ;;  %209 = vrot.lane.b32.xlu1 %v205_v2, %s613_s30  ;;  %v223_v11 = vld [vmem:[%s784_s1] sm:$0xff]  ;;  %s411_s8 = sshll.u32 %s722_s22, 3  ;;  %s414_s9 = sshll.u32 %s599_s15, 7 }
  0x2d   : > { %216 = vrot.lane.b32.xlu0 %v205_v2, %s614_s4  ;;  %s204_s10 = scalar_lea.vmem [#allocation5], %s411_s8  ;;  %s741_s21 = scalar_lea.hbm %s786_s3, %s414_s9 }
  0x2e   : > { %s320_s11 = sshll.u32 %s204_s10, 4  ;;  %s306_s23 = scalar_lea.sflag [#allocation4], %s722_s22  ;;  %s321_s11 = int_to_ptr.vmem [resolvable:$true] %s320_s11 }
  0x2f   : > { %s527_s28 = scalar_lea.vmem %s321_s11, 128  ;;  %s615_s29 = smov [#allocation5]  }
  0x30   : > { %211 = vrot.lane.b32.xlu1 %v206_v3, %s613_s30  ;;  %p528_p8 = scmp.ne.s32.totalorder %s321_s11, %s527_s28  ;;  %s531_s15 = sshll.u32 %s615_s29, 4  ;;  %s532_s15 = int_to_ptr.vmem [resolvable:$false] %s531_s15 }
  0x31   : > { %218 = vrot.lane.b32.xlu0 %v206_v3, %s614_s4  ;;  %s533_s30 = scalar_lea.vmem %s532_s15, 256  ;;  %p534_p0 = scmp.lt.s32.totalorder %s321_s11, %s532_s15 }
  0x32   : > { %p529_p11 = pnand %p528_p8, %p687_p9  ;;  %p535_p1 = scmp.lt.s32.totalorder %s533_s30, %s527_s28 }
  0x34   : > { %p530_p12 = pneg %p529_p11  ;;  %p536_p2 = por %p535_p1, %p534_p0 }
  0x35   : > { %227 = vperm.xlu0 %498, %v224_v4  }
  0x36   : > { %p537_p3 = pnand %p536_p2, %p530_p12 }
  0x9e   : > { %v210_v5 = vpop.permute.xlu1 %209 }
  0x9f   : > { %v217_v6 = vpop.permute.xlu0 %216 }
  0xa2   : > { %v212_v7 = vpop.permute.xlu1 %211 }
  0xa3   : > { %v219_v8 = vpop.permute.xlu0 %218  ;;  %v214_v10 = vsel %vm213_vm2, %v210_v5, %v212_v7 }
  0xa4   : > { %v221_v9 = vsel %vm220_vm1, %v217_v6, %v219_v8 }
  0xa5   : > { %423 = vmatpush3.msra.mxu0 %v221_v9 }
  0xa6   : > { %424 = vmatprep.subr.mxu0 %v610_v0 }
  0xa7   : > { %425 = vmatpush3.msra.mxu0 %v214_v10 }
  0xa8   : > { %426 = vmatprep.subr.mxu0 %v610_v0 }
  0xa9   : > { %427 = vmatpush3.msra.mxu0 %v205_v2 }
  0xaa   : > { %429 = vmatmul.mubr.msk.f32.vlgmr.msra.gmra.mxu0 %vm230_vm3, %v223_v11 }
  0xb0   : > { %v228_v12 = vpop.permute.xlu0 %227 }
 0x16a   : > { %v300_v13 = vpop.f32.mrf.mxu0 }
 0x16b   : > { %v301_v14 = vadd.f32 %v300_v13, %v228_v12 }
 0x16c   : > { %v430_v15 = vpop.f32.mrf.mxu0 }
 0x16d   : > { %304 = vst [vmem:[%s204_s10] sm:$0xff] %v301_v14 }
 0x16e   : > { %540 = shalt.err (!%p537_p3)
}
 0x16f   : > { %s541_s4 = scalar_lea.hbm %s741_s21, 128  ;;  %s545_s6 = scalar_lea.hbm %s786_s3, 256 }
 0x170   : > { %p542_p5 = scmp.ne.s32.totalorder %s741_s21, %s541_s4  ;;  %p546_p10 = scmp.lt.s32.totalorder %s741_s21, %s786_s3 }
 0x171   : > { %p547_p4 = scmp.lt.s32.totalorder %s545_s6, %s541_s4 }
 0x172   : > { %p543_p6 = pnand %p542_p5, %p687_p9 }
 0x173   : > { %p548_p13 = por %p547_p4, %p546_p10 }
 0x174   : > { %p544_p7 = pneg %p543_p6 }
 0x176   : > { %p549_p8 = pnand %p548_p13, %p544_p7 }
 0x178   : > { %552 = shalt.err (!%p549_p8)
}
 0x179   : > { %433 = dma.vmem_to_hbm [thread:$0]  (%p687_p9), %s321_s11, 128, %s741_s21, %s306_s23  }
 0x17a PF: > { %s332_s8 = sand.u32 1, %s587_s12   ;;  %p792_p11 = scmp.ne.s32.totalorder %s790_s27, 0 }
 0x17b   : > { %p793_p12 = scmp.ge.s32.totalorder %s607_s17, 2  ;;  %s333_s9 = scalar_lea.sflag [#allocation4], %s332_s8 }
 0x17d   : > { %p440_p0 = pnand %p793_p12, %p792_p11 }
 0x17f   : > { %p441_p1 = pneg %p440_p0 }
 0x181   : > { %582 = dma.done.wait (%p441_p1), %s333_s9, 128  }
 0x182   : > { %584 = vsyncadd (%p441_p1), %s333_s9, 4294967168  ;;  %s19_s17 = sadd.s32 1, %s607_s17   ;;  %s794_s12 = smov %s591_s13 }
 0x183   : > { %p16_p2 = scmp.ge.s32.totalorder %s19_s17, 4   ;;  %s795_s13 = smov %s595_s14 }
 0x184   : > { %s796_s14 = smov %s692_s26  ;;  %s797_s15 = smov %s603_s16 }
 0x185   : > { %s798_s16 = smov %s800_s20  ;;  %18 = sbr.rel (!%p16_p2) target bundleno = 6 (0x6), region = 77 }
 0x18a   :  { %338 = vsyncpa [#allocation3], 1 }
 0x18b   :  { %340 = vsyncpa [#allocation3 + $0x1], 1 }
 0x18c   :  { %341 = vsyncpa [#allocation4], 1 }
 0x18d   :  { %343 = vsyncpa [#allocation4 + $0x1], 1 }

</bundles_post_ra>
